<compile_context>
chip_gen: v7x
topology: tpu7x:2x2x1
jax: 0.10.0
libtpu: 0.0.40
codegen_flags: <defaults>
</compile_context>

<pallas_src>
import functools
import math

import jax
import jax.numpy as jnp
import numpy as np
from jax.experimental import pallas as pl
from jax.experimental.pallas import tpu as pltpu


# ----------------------------- tiling / VMEM helpers ------------------------

def _pick_tile(dim, target, align):
    """Largest tile <= target that exactly divides `dim` and is a multiple of
    `align` (8 for sublane dims, 128 for lane dims).  Falls back to the full
    dim, which is always a legal BlockSpec extent on the last two axes."""
    if dim <= target:
        return dim
    t = (target // align) * align
    while t >= align:
        if dim % t == 0:
            return t
        t -= align
    return dim


@functools.lru_cache(maxsize=None)
def _vmem_limit_bytes():
    """Per-generation scoped-VMEM budget (v5e/v6e: 128 MiB phys, v7x: 64 MiB)."""
    cap = None
    try:
        cap = getattr(pltpu.get_tpu_info(), "vmem_capacity_bytes", None)
    except Exception:
        cap = None
    if not cap:
        cap = 64 * 1024 * 1024          # conservative: v7x physical VMEM
    return int(min(cap * 3 // 4, 100 * 1024 * 1024))


# ----------------------- tiled linear (y = x @ w.T + b) -----------------------

def _linear_kernel(x_ref, w_ref, b_ref, o_ref, acc_ref):
    k = pl.program_id(2)

    @pl.when(k == 0)
    def _():
        acc_ref[...] = jnp.zeros_like(acc_ref)

    # x: (bm, bk), w: (bn, bk)  (PyTorch nn.Linear layout) — contract on dim 1
    # of both so the MXU is fed directly, no in-kernel transpose.
    acc_ref[...] += jax.lax.dot_general(
        x_ref[...], w_ref[...],
        dimension_numbers=(((1,), (1,)), ((), ())),
        preferred_element_type=jnp.float32,
    )

    @pl.when(k == pl.num_programs(2) - 1)
    def _():
        o_ref[...] = (acc_ref[...] + b_ref[...].astype(jnp.float32)).astype(o_ref.dtype)


def pallas_linear(x, w, b, *, tm=512, tn=512, tk=512):
    """x: (M, In), w: (Out, In), b: (Out,) -> (M, Out)."""
    M, K = x.shape
    Out = w.shape[0]
    bm = _pick_tile(M, tm, 8)       # sublane dim of x / output
    bn = _pick_tile(Out, tn, 128)   # lane dim of output, sublane of w
    bk = _pick_tile(K, tk, 128)     # lane (contraction) dim of x and w
    grid = (M // bm, Out // bn, K // bk)
    b2 = b.reshape(1, Out)
    return pl.pallas_call(
        _linear_kernel,
        out_shape=jax.ShapeDtypeStruct((M, Out), x.dtype),
        grid=grid,
        in_specs=[
            pl.BlockSpec((bm, bk), lambda i, j, k: (i, k)),
            pl.BlockSpec((bn, bk), lambda i, j, k: (j, k)),
            pl.BlockSpec((1, bn), lambda i, j, k: (0, j)),
        ],
        out_specs=pl.BlockSpec((bm, bn), lambda i, j, k: (i, j)),
        scratch_shapes=[pltpu.VMEM((bm, bn), jnp.float32)],
        compiler_params=pltpu.CompilerParams(
            dimension_semantics=("parallel", "parallel", "arbitrary"),
            vmem_limit_bytes=_vmem_limit_bytes(),
        ),
    )(x, w, b2)


# ----------------------- attention core: need_weights=True -------------------
# Grid (N, L_tiles): one batch element x one query tile per step; all H heads
# of that tile are processed in-body (the full-E K/V block is loaded once and
# shared by every head).  Softmax normalization is exact so the returned
# attention-weight rows sum to 1.
# TODO(synk): for need_weights=True with very long S, tile K/V over S with a
# two-pass (stats + normalize) scheme; here S is kept whole because the (L, S)
# weights are themselves a required output.

def _attn_weights_kernel(q_ref, k_ref, v_ref, o_ref, w_ref, wsum_ref,
                         *, num_heads, head_dim, scale):
    H, Dh = num_heads, head_dim
    q = q_ref[0]      # (tl, E)
    k = k_ref[0]      # (S, E)
    v = v_ref[0]      # (S, E)

    # Static head loop; every head's results are flushed to refs immediately so
    # per-head (tl, S) temporaries die each iteration (bounded live ranges).
    # TODO(synk): for H >= 8 move heads to a grid axis with a head-major layout.
    for h in range(H):
        lo = h * Dh
        s = jax.lax.dot_general(                       # (tl, S) scores
            q[:, lo:lo + Dh], k[:, lo:lo + Dh],
            dimension_numbers=(((1,), (1,)), ((), ())),
            preferred_element_type=jnp.float32,
        ) * scale                                      # scale applied in f32
        s = s - jnp.max(s, axis=-1, keepdims=True)
        p = jnp.exp(s)
        wh = p / jnp.sum(p, axis=-1, keepdims=True)    # exact: rows sum to 1

        oh = jax.lax.dot_general(                      # (tl, Dh)
            wh.astype(v.dtype), v[:, lo:lo + Dh],
            dimension_numbers=(((1,), (0,)), ((), ())),
            preferred_element_type=jnp.float32,
        )
        # Static-column store into the (1, tl, E) output VMEM block; the HBM
        # writeback stays a single lane-dense E-wide slab per grid step.
        o_ref[0, :, lo:lo + Dh] = oh.astype(o_ref.dtype)

        if h == 0:
            wsum_ref[...] = wh
        else:
            wsum_ref[...] += wh

    # In-kernel head averaging (average_attn_weights=True), f32 accumulate.
    w_ref[0] = (wsum_ref[...] * (1.0 / H)).astype(w_ref.dtype)


def pallas_mha_with_weights(q, k, v, num_heads, scale, *, tl_target=256):
    """q: (N, L, E), k/v: (N, S, E) -> (attn_out (N, L, E), weights (N, L, S))."""
    N, L, E = q.shape
    S = k.shape[1]
    Dh = E // num_heads
    tl = _pick_tile(L, tl_target, 8)
    kernel = functools.partial(_attn_weights_kernel, num_heads=num_heads,
                               head_dim=Dh, scale=scale)
    return pl.pallas_call(
        kernel,
        out_shape=(
            jax.ShapeDtypeStruct((N, L, E), q.dtype),
            jax.ShapeDtypeStruct((N, L, S), q.dtype),
        ),
        grid=(N, L // tl),
        in_specs=[
            pl.BlockSpec((1, tl, E), lambda n, lt: (n, lt, 0)),
            pl.BlockSpec((1, S, E), lambda n, lt: (n, 0, 0)),
            pl.BlockSpec((1, S, E), lambda n, lt: (n, 0, 0)),
        ],
        out_specs=(
            pl.BlockSpec((1, tl, E), lambda n, lt: (n, lt, 0)),
            pl.BlockSpec((1, tl, S), lambda n, lt: (n, lt, 0)),
        ),
        scratch_shapes=[pltpu.VMEM((tl, S), jnp.float32)],
        compiler_params=pltpu.CompilerParams(
            dimension_semantics=("parallel", "parallel"),
            vmem_limit_bytes=_vmem_limit_bytes(),
        ),
    )(q, k, v)


# ----------------------- attention core: need_weights=False ------------------
# Flash / online-softmax.  Head-major (N*H, L, Dh) layout; grid
# (N*H, L_tiles, S_tiles) with the KV axis innermost & "arbitrary"; per-step
# VMEM is bounded by tile-sized blocks independent of L and S.

def _attn_flash_kernel(q_ref, k_ref, v_ref, o_ref, m_ref, l_ref, acc_ref, *, scale):
    st = pl.program_id(2)

    @pl.when(st == 0)
    def _():
        m_ref[...] = jnp.full_like(m_ref, -jnp.inf)
        l_ref[...] = jnp.zeros_like(l_ref)
        acc_ref[...] = jnp.zeros_like(acc_ref)

    s = jax.lax.dot_general(                           # (tl, ts), f32
        q_ref[0], k_ref[0],
        dimension_numbers=(((1,), (1,)), ((), ())),
        preferred_element_type=jnp.float32,
    ) * scale
    m_prev = m_ref[...]
    m_new = jnp.maximum(m_prev, jnp.max(s, axis=-1, keepdims=True))
    alpha = jnp.exp(m_prev - m_new)
    p = jnp.exp(s - m_new)
    l_ref[...] = alpha * l_ref[...] + jnp.sum(p, axis=-1, keepdims=True)
    acc_ref[...] = alpha * acc_ref[...] + jax.lax.dot_general(
        p.astype(v_ref.dtype), v_ref[0],
        dimension_numbers=(((1,), (0,)), ((), ())),
        preferred_element_type=jnp.float32,
    )
    m_ref[...] = m_new

    @pl.when(st == pl.num_programs(2) - 1)
    def _():
        o_ref[0] = (acc_ref[...] *
                    pl.reciprocal(l_ref[...], approx=True)).astype(o_ref.dtype)


def pallas_mha_flash(qh, kh, vh, scale, *, tl_target=256, ts_target=512):
    """qh: (B, L, Dh), kh/vh: (B, S, Dh) with B = N*H -> (B, L, Dh)."""
    B, L, Dh = qh.shape
    S = kh.shape[1]
    tl = _pick_tile(L, tl_target, 8)
    ts = _pick_tile(S, ts_target, 8)
    kernel = functools.partial(_attn_flash_kernel, scale=scale)
    return pl.pallas_call(
        kernel,
        out_shape=jax.ShapeDtypeStruct((B, L, Dh), qh.dtype),
        grid=(B, L // tl, S // ts),
        in_specs=[
            pl.BlockSpec((1, tl, Dh), lambda b, lt, st: (b, lt, 0)),
            pl.BlockSpec((1, ts, Dh), lambda b, lt, st: (b, st, 0)),
            pl.BlockSpec((1, ts, Dh), lambda b, lt, st: (b, st, 0)),
        ],
        out_specs=pl.BlockSpec((1, tl, Dh), lambda b, lt, st: (b, lt, 0)),
        scratch_shapes=[pltpu.VMEM((tl, 1), jnp.float32),
                        pltpu.VMEM((tl, 1), jnp.float32),
                        pltpu.VMEM((tl, Dh), jnp.float32)],
        compiler_params=pltpu.CompilerParams(
            dimension_semantics=("parallel", "parallel", "arbitrary"),
            vmem_limit_bytes=_vmem_limit_bytes(),
        ),
    )(qh, kh, vh)


# ----------------------- forward wrapper -------------------------------------

def multihead_attn_forward(query, key, value, params, num_heads, need_weights=True):
    """Replicates nn.MultiheadAttention(embed_dim, num_heads) forward."""
    L, N, E = query.shape
    S = key.shape[0]
    H = num_heads
    Dh = E // H
    scale = 1.0 / math.sqrt(Dh)

    w_in, b_in = params["in_proj_weight"], params["in_proj_bias"]
    wq, wk, wv = w_in[:E], w_in[E:2 * E], w_in[2 * E:]
    bq, bk, bv = b_in[:E], b_in[E:2 * E], b_in[2 * E:]

    # One relayout of the RAW inputs to batch-major; projections then emit
    # q/k/v directly in the (N, L, E) layout the attention core consumes
    # (no fused-QKV output slicing, no post-projection transposes).
    q_in = query.transpose(1, 0, 2).reshape(N * L, E)
    k_in = key.transpose(1, 0, 2).reshape(N * S, E)
    v_in = value.transpose(1, 0, 2).reshape(N * S, E)

    q = pallas_linear(q_in, wq, bq).reshape(N, L, E)
    k = pallas_linear(k_in, wk, bk).reshape(N, S, E)
    v = pallas_linear(v_in, wv, bv).reshape(N, S, E)

    if need_weights:
        attn, w_avg = pallas_mha_with_weights(q, k, v, H, scale)   # (N,L,E),(N,L,S)
    else:
        # Head-major flash path: bounded VMEM, heads/L/S as grid axes.
        # TODO(synk): fold the head-major relayout into projection BlockSpecs.
        qh = q.reshape(N, L, H, Dh).transpose(0, 2, 1, 3).reshape(N * H, L, Dh)
        kh = k.reshape(N, S, H, Dh).transpose(0, 2, 1, 3).reshape(N * H, S, Dh)
        vh = v.reshape(N, S, H, Dh).transpose(0, 2, 1, 3).reshape(N * H, S, Dh)
        oh = pallas_mha_flash(qh, kh, vh, scale)                   # (N*H, L, Dh)
        attn = oh.reshape(N, H, L, Dh).transpose(0, 2, 1, 3).reshape(N, L, E)
        w_avg = None

    # Output projection on the merged-head activations, back to (L, N, E).
    out = pallas_linear(
        attn.reshape(N * L, E),
        params["out_proj_weight"], params["out_proj_bias"],
    ).reshape(N, L, E).transpose(1, 0, 2)
    return out, w_avg


def init_params(key, embed_dim):
    # Deterministic synthetic parameters (shapes match nn.MultiheadAttention).
    k1, k2, _ = jax.random.split(key, 3)
    E = embed_dim
    bound = 1.0 / math.sqrt(E)
    return {
        "in_proj_weight": jax.random.uniform(
            k1, (3 * E, E), jnp.float32, -bound, bound),
        "in_proj_bias": jnp.zeros((3 * E,), jnp.float32),
        "out_proj_weight": jax.random.uniform(
            k2, (E, E), jnp.float32, -bound, bound),
        "out_proj_bias": jnp.zeros((E,), jnp.float32),
    }


# ----------------------- pure-JAX reference (correctness check) --------------

def _reference_mha(query, key, value, params, num_heads):
    L, N, E = query.shape
    S = key.shape[0]
    H = num_heads
    Dh = E // H
    hp = jax.lax.Precision.HIGHEST
    w_in, b_in = params["in_proj_weight"], params["in_proj_bias"]
    q = jnp.einsum("lne,oe->lno", query, w_in[:E], precision=hp) + b_in[:E]
    k = jnp.einsum("lne,oe->lno", key, w_in[E:2 * E], precision=hp) + b_in[E:2 * E]
    v = jnp.einsum("lne,oe->lno", value, w_in[2 * E:], precision=hp) + b_in[2 * E:]
    q = q.reshape(L, N * H, Dh).transpose(1, 0, 2) * (1.0 / math.sqrt(Dh))
    k = k.reshape(S, N * H, Dh).transpose(1, 0, 2)
    v = v.reshape(S, N * H, Dh).transpose(1, 0, 2)
    s = jnp.einsum("bld,bsd->bls", q, k, precision=hp)
    w = jax.nn.softmax(s, axis=-1)
    o = jnp.einsum("bls,bsd->bld", w, v, precision=hp)
    o = o.transpose(1, 0, 2).reshape(L * N, E)
    out = jnp.einsum("me,oe->mo", o, params["out_proj_weight"], precision=hp)
    out = (out + params["out_proj_bias"]).reshape(L, N, E)
    w_avg = w.reshape(N, H, L, S).mean(axis=1)
    return out, w_avg


if __name__ == "__main__":
    embed_dim = 32
    num_heads = 4
    seq_len = 8      # L == S
    batch = 2

    root = jax.random.PRNGKey(0)
    kq, kk, kv, kp = jax.random.split(root, 4)

    query = jax.random.normal(kq, (seq_len, batch, embed_dim), jnp.float32)
    key = jax.random.normal(kk, (seq_len, batch, embed_dim), jnp.float32)
    value = jax.random.normal(kv, (seq_len, batch, embed_dim), jnp.float32)
    params = init_params(kp, embed_dim)

    # Cross-attention, default PyTorch semantics (need_weights=True).
    out, attn_w = multihead_attn_forward(query, key, value, params, num_heads)
    # Self-attention inputs through the same path.
    out_sa, attn_w_sa = multihead_attn_forward(query, query, query, params, num_heads)
    # Flash (need_weights=False) path.
    out_nw, w_none = multihead_attn_forward(query, key, value, params, num_heads,
                                            need_weights=False)
    jax.block_until_ready((out, attn_w, out_sa, attn_w_sa, out_nw))

    assert out.shape == (seq_len, batch, embed_dim)
    assert attn_w.shape == (batch, seq_len, seq_len)
    assert out_sa.shape == (seq_len, batch, embed_dim)
    assert out_nw.shape == (seq_len, batch, embed_dim)
    assert w_none is None

    ref_out, ref_w = _reference_mha(query, key, value, params, num_heads)
    np.testing.assert_allclose(np.asarray(out), np.asarray(ref_out), rtol=2e-2, atol=2e-2)
    np.testing.assert_allclose(np.asarray(attn_w), np.asarray(ref_w), rtol=2e-2, atol=2e-2)
    np.testing.assert_allclose(np.asarray(out_nw), np.asarray(ref_out), rtol=2e-2, atol=2e-2)
    ref_out_sa, ref_w_sa = _reference_mha(query, query, query, params, num_heads)
    np.testing.assert_allclose(np.asarray(out_sa), np.asarray(ref_out_sa), rtol=2e-2, atol=2e-2)
    np.testing.assert_allclose(np.asarray(attn_w_sa), np.asarray(ref_w_sa), rtol=2e-2, atol=2e-2)
    # Exact softmax normalization on the weights path: rows sum to 1.
    row_sums = np.asarray(attn_w).sum(-1)
    np.testing.assert_allclose(row_sums, np.ones_like(row_sums), rtol=1e-3, atol=1e-3)

    print("KERNEL_OK")
</pallas_src>

<mosaic_0001>
module attributes {stable_mosaic.version = 11 : i64} {
  func.func @_linear_kernel(%arg0: i32, %arg1: i32, %arg2: i32, %arg3: memref<16x32xf32, #tpu.memory_space<vmem>>, %arg4: memref<32x32xf32, #tpu.memory_space<vmem>>, %arg5: memref<1x32xf32, #tpu.memory_space<vmem>>, %arg6: memref<16x32xf32, #tpu.memory_space<vmem>>, %arg7: memref<16x32xf32, #tpu.memory_space<vmem>>) attributes {dimension_semantics = [#tpu.dimension_semantics<parallel>, #tpu.dimension_semantics<parallel>, #tpu.dimension_semantics<arbitrary>], iteration_bounds = array<i64: 1, 1, 1>, scalar_prefetch = 0 : i64, scratch_operands = 1 : i64, tpu.core_type = #tpu.core_type<tc>, window_params = [{transform_indices = @transform_0, window_bounds = array<i64: 16, 32>}, {transform_indices = @transform_1, window_bounds = array<i64: 32, 32>}, {transform_indices = @transform_2, window_bounds = array<i64: 1, 32>}, {transform_indices = @transform_3, window_bounds = array<i64: 16, 32>}]} {
    %c0_i32 = arith.constant 0 : i32
    %0 = arith.cmpi eq, %arg2, %c0_i32 : i32
    %1 = arith.extui %0 : i1 to i32
    %c0_i32_0 = arith.constant 0 : i32
    %2 = arith.cmpi ne, %1, %c0_i32_0 : i32
    scf.if %2 {
      %cst_10 = arith.constant 0.000000e+00 : f32
      %12 = vector.broadcast %cst_10 : f32 to vector<16x32xf32>
      %c0_11 = arith.constant 0 : index
      %c0_12 = arith.constant 0 : index
      %13 = vector.load %arg7[%c0_11, %c0_12] : memref<16x32xf32, #tpu.memory_space<vmem>>, vector<16x32xf32>
      tpu.vector_store %arg7[%c0_11, %c0_12], %12 {strides = array<i32>} : memref<16x32xf32, #tpu.memory_space<vmem>>, vector<16x32xf32>,
    } else {
    }
    %c0 = arith.constant 0 : index
    %c0_1 = arith.constant 0 : index
    %3 = vector.load %arg7[%c0, %c0_1] : memref<16x32xf32, #tpu.memory_space<vmem>>, vector<16x32xf32>
    %c0_2 = arith.constant 0 : index
    %c0_3 = arith.constant 0 : index
    %4 = vector.load %arg3[%c0_2, %c0_3] : memref<16x32xf32, #tpu.memory_space<vmem>>, vector<16x32xf32>
    %c0_4 = arith.constant 0 : index
    %c0_5 = arith.constant 0 : index
    %5 = vector.load %arg4[%c0_4, %c0_5] : memref<32x32xf32, #tpu.memory_space<vmem>>, vector<32x32xf32>
    %cst = arith.constant dense<0.000000e+00> : vector<16x32xf32>
    %6 = tpu.matmul %4, %5, %cst {dimension_numbers = #tpu.dot_dimension_numbers<[1], [1], [0], [0], [0, 0, 1, 0], [], []>} : vector<16x32xf32>, vector<32x32xf32>, vector<16x32xf32> -> vector<16x32xf32>
    %7 = arith.addf %3, %6 : vector<16x32xf32>
    %c0_6 = arith.constant 0 : index
    %c0_7 = arith.constant 0 : index
    %8 = vector.load %arg7[%c0_6, %c0_7] : memref<16x32xf32, #tpu.memory_space<vmem>>, vector<16x32xf32>
    tpu.vector_store %arg7[%c0_6, %c0_7], %7 {strides = array<i32>} : memref<16x32xf32, #tpu.memory_space<vmem>>, vector<16x32xf32>,
    %c0_i32_8 = arith.constant 0 : i32
    %9 = arith.cmpi eq, %arg2, %c0_i32_8 : i32
    %10 = arith.extui %9 : i1 to i32
    %c0_i32_9 = arith.constant 0 : i32
    %11 = arith.cmpi ne, %10, %c0_i32_9 : i32
    scf.if %11 {
      %c0_10 = arith.constant 0 : index
      %c0_11 = arith.constant 0 : index
      %12 = vector.load %arg7[%c0_10, %c0_11] : memref<16x32xf32, #tpu.memory_space<vmem>>, vector<16x32xf32>
      %c0_12 = arith.constant 0 : index
      %c0_13 = arith.constant 0 : index
      %13 = vector.load %arg5[%c0_12, %c0_13] : memref<1x32xf32, #tpu.memory_space<vmem>>, vector<1x32xf32>
      %14 = vector.broadcast %13 : vector<1x32xf32> to vector<16x32xf32>
      %15 = arith.addf %12, %14 : vector<16x32xf32>
      %c0_14 = arith.constant 0 : index
      %c0_15 = arith.constant 0 : index
      %16 = vector.load %arg6[%c0_14, %c0_15] : memref<16x32xf32, #tpu.memory_space<vmem>>, vector<16x32xf32>
      tpu.vector_store %arg6[%c0_14, %c0_15], %15 {strides = array<i32>} : memref<16x32xf32, #tpu.memory_space<vmem>>, vector<16x32xf32>,
    } else {
    }
    return
  }
  func.func @transform_0(%arg0: i32, %arg1: i32, %arg2: i32) -> (i32, i32) {
    %c0_i32 = arith.constant 0 : i32
    return %arg0, %arg2 : i32, i32
  }
  func.func @transform_1(%arg0: i32, %arg1: i32, %arg2: i32) -> (i32, i32) {
    %c0_i32 = arith.constant 0 : i32
    return %arg1, %arg2 : i32, i32
  }
  func.func @transform_2(%arg0: i32, %arg1: i32, %arg2: i32) -> (i32, i32) {
    %c0_i32 = arith.constant 0 : i32
    %c0_i32_0 = arith.constant 0 : i32
    return %c0_i32, %arg1 : i32, i32
  }
  func.func @transform_3(%arg0: i32, %arg1: i32, %arg2: i32) -> (i32, i32) {
    %c0_i32 = arith.constant 0 : i32
    return %arg0, %arg1 : i32, i32
  }
}

</mosaic_0001>

<bundles_post_ra>
// kernel: tpu_custom_call.1
= control target key start
LH: loop header
LB: loop body
LE: loop exit
PB: predicated region body
PF: predicated region fallthrough
CT: control target
= control target key end

     0   :  { %8 = vsyncpa [#allocation4], 0  ;;  %s388_s0 = inlined_call_operand.hbm [shape: f32[16,32], index: 0, kind: input, shape index: {}]   ;;  %s389_s1 = inlined_call_operand.hbm [shape: f32[32,32], index: 1, kind: input, shape index: {}]   ;;  %s390_s2 = inlined_call_operand.vmem [shape: f32[1,32], index: 2, kind: input, shape index: {}]   ;;  %s391_s3 = inlined_call_operand.hbm [shape: f32[16,32], index: 3, kind: output, shape index: {}]  }
   0x1   :  { %9 = vsyncpa [#allocation7], 0 }
   0x2   :  { %10 = vsyncpa [#allocation5], 0  ;;  %s304_s12 = smov [#allocation3]   ;;  %s232_s16 = scalar_lea.hbm %s388_s0, 256 }
   0x3   :  { %s16_s13 = sshll.u32 %s304_s12, 4  ;;  %p233_p0 = scmp.ne.s32.totalorder %s388_s0, %s232_s16  ;;  %s17_s13 = int_to_ptr.vmem [resolvable:$true] %s16_s13 }
   0x4   :  { %p236_p1 = scmp.lt.u32.totalorder %s232_s16, %s388_s0 }
   0x6   :  { %p238_p2 = pnand %p236_p1, %p233_p0 }
   0x8   :  { %241 = shalt.err (!%p238_p2)
}
   0x9   :  { %s242_s21 = scalar_lea.vmem %s17_s13, 256  ;;  %p247_p4 = scmp.lt.s32.totalorder %s17_s13, %s17_s13 }
   0xa   :  { %p243_p3 = scmp.ne.s32.totalorder %s17_s13, %s242_s21  ;;  %p248_p5 = scmp.lt.s32.totalorder %s242_s21, %s242_s21 }
   0xc   :  { %p249_p6 = por %p248_p5, %p247_p4 }
   0xe   :  { %p250_p7 = pnand %p249_p6, %p243_p3 }
  0x10   :  { %253 = shalt.err (!%p250_p7)
}
  0x11   :  { %s305_s22 = smov 128   ;;  %s306_s23 = smov 8  }
  0x12   :  { %22 = dma.hbm_to_vmem [thread:$0]  %s388_s0, 256, %s17_s13, [#allocation4], %s305_s22, %s305_s22, %s306_s23  }
  0x13   :  { %s307_s26 = smov [#allocation6]   ;;  %s254_s30 = scalar_lea.hbm %s389_s1, 512 }
  0x14   :  { %s28_s27 = sshll.u32 %s307_s26, 4  ;;  %p255_p8 = scmp.ne.s32.totalorder %s389_s1, %s254_s30  ;;  %s29_s27 = int_to_ptr.vmem [resolvable:$true] %s28_s27 }
  0x15   :  { %p258_p9 = scmp.lt.u32.totalorder %s254_s30, %s389_s1 }
  0x17   :  { %p260_p10 = pnand %p258_p9, %p255_p8 }
  0x19   :  { %263 = shalt.err (!%p260_p10)
}
  0x1a   :  { %s264_s8 = scalar_lea.vmem %s29_s27, 512  ;;  %p269_p12 = scmp.lt.s32.totalorder %s29_s27, %s29_s27 }
  0x1b   :  { %p265_p11 = scmp.ne.s32.totalorder %s29_s27, %s264_s8  ;;  %p270_p13 = scmp.lt.s32.totalorder %s264_s8, %s264_s8 }
  0x1d   :  { %p271_p0 = por %p270_p13, %p269_p12 }
  0x1f   :  { %p272_p1 = pnand %p271_p0, %p265_p11 }
  0x21   :  { %275 = shalt.err (!%p272_p1)
}
  0x22   :  { %34 = dma.hbm_to_vmem [thread:$0]  %s389_s1, 512, %s29_s27, [#allocation7], %s305_s22, %s305_s22, %s306_s23  }
  0x23   :  { %298 = dma.done.wait [#allocation4], 256  }
  0x24   :  { %299 = vsyncadd [#allocation4], 4294967040 }
  0x25   :  { %300 = dma.done.wait [#allocation7], 512  }
  0x26   :  { %301 = vsyncadd [#allocation7], 4294966784  ;;  %vm47_vm0 = vcmask 261120   ;;  %v308_v0 = vmov 0.0   ;;  %v54_v1 = vld [vmem:[#allocation6] sm:$0xff]  ;;  %v55_v2 = vld [vmem:[#allocation6 + $0x8] sm:$0xff] }
  0x27   :  { %49 = vst.msk [vmem:[#allocation2 + $0x8] sm:$0xff] %vm47_vm0, %v308_v0  ;;  %48 = vst.msk [vmem:[#allocation2] sm:$0xff] %vm47_vm0, %v308_v0  ;;  %v56_v3 = vld [vmem:[#allocation6 + $0x10] sm:$0xff]  ;;  %v214_v4 = vpack.c.bf16 %v55_v2, %v54_v1  ;;  %v57_v5 = vld [vmem:[#allocation6 + $0x18] sm:$0xff]  ;;  %s309_s11 = smov [#allocation8]  }
  0x28   :  { %vm215_vm1 = vmpackc.low %vm47_vm0, %vm47_vm0  ;;  %v52_v6 = vld [vmem:[#allocation3] sm:$0xff]  ;;  %v220_v7 = vpack.c.bf16 %v57_v5, %v56_v3  ;;  %v53_v8 = vld [vmem:[#allocation3 + $0x8] sm:$0xff]  ;;  %s177_s12 = sshll.u32 %s309_s11, 4  ;;  %s178_s12 = int_to_ptr.vmem [resolvable:$true] %s177_s12 }
  0x29   :  { %211 = vmatprep.mubr.msk.f32.mxu0 %vm47_vm0, %v52_v6  ;;  %216 = vmatprep.subr.msk.bf16.mxu0 %vm215_vm1, %v214_v4  ;;  %v196_v15 = vld [vmem:[%s390_s2] ss:$0 sm:$0xff]  ;;  %s276_s13 = scalar_lea.vmem %s178_s12, 256  ;;  %p281_p3 = scmp.lt.s32.totalorder %s178_s12, %s178_s12 }
  0x2a   :  { %219 = vmatpush3.bf16.xpose.msk.msra.mxu0 %vm215_vm1, %v214_v4  ;;  %p277_p2 = scmp.ne.s32.totalorder %s178_s12, %s276_s13  ;;  %p282_p4 = scmp.lt.s32.totalorder %s276_s13, %s276_s13 }
  0x2b   :  { %222 = vmatprep.subr.msk.bf16.mxu0 %vm215_vm1, %v220_v7 }
  0x2c   :  { %p283_p5 = por %p282_p4, %p281_p3 }
  0x2e   :  { %v51_v9 = vld [vmem:[#allocation2 + $0x8] sm:$0xff]  ;;  %v50_v10 = vld [vmem:[#allocation2] sm:$0xff]  ;;  %p284_p6 = pnand %p283_p5, %p277_p2 }
  0x32   :  { %225 = vmatpush3.bf16.xpose.msk.msra.mxu0 %vm215_vm1, %v220_v7 }
  0x39   :  { %212 = vmatmul.mubr.msk.f32.vlgmr.msra.gmra.mrb[0].mxu0 %vm47_vm0, %v53_v8 }
 0x10c   :  { %v213_v11 = vpop.f32.mrb[0].mxu0 }
 0x10d   :  { %v153_v12 = vadd.f32 %v213_v11, %v51_v9  ;;  %v143_v13 = vpop.f32.mrb[1].mxu0 }
 0x10e   :  { %v152_v14 = vadd.f32 %v143_v13, %v50_v10 }
 0x10f   :  { %155 = vst.msk [vmem:[#allocation2 + $0x8] sm:$0xff] %vm47_vm0, %v153_v12 }
 0x110   :  { %154 = vst.msk [vmem:[#allocation2] sm:$0xff] %vm47_vm0, %v152_v14 }
 0x116   :  { %v160_v16 = vld [vmem:[#allocation2 + $0x8] sm:$0xff] }
 0x117   :  { %v159_v17 = vld [vmem:[#allocation2] sm:$0xff]  ;;  %v169_v18 = vadd.f32 %v196_v15, %v160_v16 }
 0x118   :  { %v168_v19 = vadd.f32 %v196_v15, %v159_v17 }
 0x119   :  { %171 = vst.msk [vmem:[#allocation8 + $0x8] sm:$0xff] %vm47_vm0, %v169_v18 }
 0x11a   :  { %170 = vst.msk [vmem:[#allocation8] sm:$0xff] %vm47_vm0, %v168_v19 }
 0x11b   :  { %287 = shalt.err (!%p284_p6)
}
 0x11c   :  { %s288_s15 = scalar_lea.hbm %s391_s3, 256 }
 0x11d   :  { %p289_p7 = scmp.ne.s32.totalorder %s391_s3, %s288_s15  ;;  %p292_p8 = scmp.lt.u32.totalorder %s288_s15, %s391_s3 }
 0x11f   :  { %p294_p9 = pnand %p292_p8, %p289_p7 }
 0x121   :  { %297 = shalt.err (!%p294_p9)
}
 0x122   :  { %183 = dma.vmem_to_hbm [thread:$0]  %s178_s12, 256, %s391_s3, [#allocation5], %s305_s22, %s305_s22, %s306_s23  }
 0x123   :  { %302 = dma.done.wait [#allocation5], 256  }
 0x124   :  { %303 = vsyncadd [#allocation5], 4294967040 }
 0x125   :  { %187 = vsyncpa [#allocation4], 1 }
 0x126   :  { %188 = vsyncpa [#allocation7], 1 }
 0x127   :  { %189 = vsyncpa [#allocation5], 1 }

</bundles_post_ra>
